<compile_context>
chip_gen: v7x
topology: tpu7x:2x2x1
jax: 0.10.0
libtpu: 0.0.40
codegen_flags: <defaults>
</compile_context>

<pallas_src>
import jax
import jax.numpy as jnp
from jax.experimental import pallas as pl
from jax.experimental.pallas import tpu as pltpu

EMBED_DIM = 768     # K
TAG_VEC_DIM = 384   # N


def classifier_kernel(x_ref, w_ref, b_ref, o_ref):
    # Single-shot GEMM; all operands resident in VMEM (no grid, no pipeline).
    # x is down-cast to bf16 in-kernel; the weight arrives already bf16.
    x_bf16 = x_ref[...].astype(jnp.bfloat16)
    acc = jnp.dot(x_bf16, w_ref[...], preferred_element_type=jnp.float32)
    o_ref[...] = (acc + b_ref[...]).astype(o_ref.dtype)


def classifier_forward(x, w_t_bf16, b):
    """out = x @ w_t_bf16 + b, equivalent to torch.nn.Linear(EMBED_DIM, TAG_VEC_DIM).

    x:        [B, EMBED_DIM]           (any float dtype; output keeps x.dtype)
    w_t_bf16: [EMBED_DIM, TAG_VEC_DIM] bf16, persisted once at param-load time
              (torch weight is [N, K]; this is its transpose)
    b:        [TAG_VEC_DIM]            f32 bias

    Matmul runs in bf16 on the MXU with f32 accumulation; the bias add is f32.
    """
    B, K = x.shape
    K2, N = w_t_bf16.shape
    assert K == K2 and b.shape == (N,)
    assert w_t_bf16.dtype == jnp.bfloat16
    # Single-block M: tile the batch dimension if B ever grows past this.
    assert B <= 1024, "tile the M (batch) dimension for very large B"

    b2 = b.reshape(1, N).astype(jnp.float32)

    bytes_accessed = (
        x.size * x.dtype.itemsize          # activations in
        + w_t_bf16.size * 2                # bf16 weight (dominant)
        + b2.size * 4                      # bias
        + B * N * x.dtype.itemsize         # output
    )

    return pl.pallas_call(
        classifier_kernel,
        out_shape=jax.ShapeDtypeStruct((B, N), x.dtype),
        in_specs=[
            pl.BlockSpec(memory_space=pltpu.MemorySpace.VMEM),  # full x
            pl.BlockSpec(memory_space=pltpu.MemorySpace.VMEM),  # full weight
            pl.BlockSpec(memory_space=pltpu.MemorySpace.VMEM),  # bias row
        ],
        out_specs=pl.BlockSpec(memory_space=pltpu.MemorySpace.VMEM),
        cost_estimate=pl.CostEstimate(
            flops=2 * B * K * N,
            transcendentals=0,
            bytes_accessed=bytes_accessed,
        ),
    )(x, w_t_bf16, b2)


if __name__ == "__main__":
    key = jax.random.PRNGKey(0)
    kx, kw, kb = jax.random.split(key, 3)

    B = 8  # small batch of feature vectors
    x = jax.random.normal(kx, (B, EMBED_DIM), dtype=jnp.float32)

    # Deterministic parameter init (stand-in for init_network).
    # TODO(synk): checkpoint loading from './Bert_Para/classifier.pt' is
    # host-side I/O and not part of the kernel; params are built in-script.
    w = jax.random.normal(kw, (TAG_VEC_DIM, EMBED_DIM), dtype=jnp.float32) * 0.02
    b = jax.random.normal(kb, (TAG_VEC_DIM,), dtype=jnp.float32) * 0.02

    # Persist the weight pre-transposed and in bf16 ONCE (parameter-load time),
    # not per call: the kernel's HBM traffic is dominated by this 576 KiB load.
    w_t_bf16 = jnp.asarray(w.T, dtype=jnp.bfloat16)  # [EMBED_DIM, TAG_VEC_DIM]

    out = classifier_forward(x, w_t_bf16, b)
    jax.block_until_ready(out)

    # Reference: same bf16 rounding of x and W, f32 accumulation, f32 bias add.
    x_q = x.astype(jnp.bfloat16).astype(jnp.float32)
    w_q = w_t_bf16.astype(jnp.float32)
    ref = x_q @ w_q + b

    assert out.shape == (B, TAG_VEC_DIM)
    assert out.dtype == x.dtype
    assert jnp.allclose(out, ref, atol=1e-2, rtol=1e-2)
    print("KERNEL_OK")
</pallas_src>

<mosaic_0001>
module attributes {stable_mosaic.version = 11 : i64} {
  func.func @classifier_kernel(%arg0: memref<8x768xf32, #tpu.memory_space<vmem>>, %arg1: memref<768x384xbf16, #tpu.memory_space<vmem>>, %arg2: memref<1x384xf32, #tpu.memory_space<vmem>>, %arg3: memref<8x384xf32, #tpu.memory_space<vmem>>) attributes {dimension_semantics = [], scalar_prefetch = 0 : i64, scratch_operands = 0 : i64, tpu.core_type = #tpu.core_type<tc>} {
    %c0 = arith.constant 0 : index
    %c0_0 = arith.constant 0 : index
    %0 = vector.load %arg0[%c0, %c0_0] : memref<8x768xf32, #tpu.memory_space<vmem>>, vector<8x768xf32>
    %1 = arith.truncf %0 : vector<8x768xf32> to vector<8x768xbf16>
    %c0_1 = arith.constant 0 : index
    %c0_2 = arith.constant 0 : index
    %2 = vector.load %arg1[%c0_1, %c0_2] : memref<768x384xbf16, #tpu.memory_space<vmem>>, vector<768x384xbf16>
    %cst = arith.constant dense<0.000000e+00> : vector<8x384xf32>
    %3 = tpu.matmul %1, %2, %cst {dimension_numbers = #tpu.dot_dimension_numbers<[1], [0], [0], [1], [0, 0, 1, 1], [], []>} : vector<8x768xbf16>, vector<768x384xbf16>, vector<8x384xf32> -> vector<8x384xf32>
    %c0_3 = arith.constant 0 : index
    %c0_4 = arith.constant 0 : index
    %4 = vector.load %arg2[%c0_3, %c0_4] : memref<1x384xf32, #tpu.memory_space<vmem>>, vector<1x384xf32>
    %5 = vector.broadcast %4 : vector<1x384xf32> to vector<8x384xf32>
    %6 = arith.addf %3, %5 : vector<8x384xf32>
    %c0_5 = arith.constant 0 : index
    %c0_6 = arith.constant 0 : index
    %7 = vector.load %arg3[%c0_5, %c0_6] : memref<8x384xf32, #tpu.memory_space<vmem>>, vector<8x384xf32>
    tpu.vector_store %arg3[%c0_5, %c0_6], %6 {strides = array<i32>} : memref<8x384xf32, #tpu.memory_space<vmem>>, vector<8x384xf32>,
    return
  }
}

</mosaic_0001>

<bundles_post_ra>
// kernel: tpu_custom_call.1
= control target key start
LH: loop header
LB: loop body
LE: loop exit
PB: predicated region body
PF: predicated region fallthrough
CT: control target
= control target key end

     0   :  { %8 = vsyncpa [#allocation3], 0  ;;  %s1871_s0 = inlined_call_operand.hbm [shape: f32[8,768], index: 0, kind: input, shape index: {}]   ;;  %s1872_s1 = inlined_call_operand.hbm [shape: bf16[768,384], index: 1, kind: input, shape index: {}]   ;;  %s1873_s2 = inlined_call_operand.vmem [shape: f32[1,384], index: 2, kind: input, shape index: {}]   ;;  %s1874_s3 = inlined_call_operand.hbm [shape: f32[8,384], index: 3, kind: output, shape index: {}]  }
   0x1   :  { %9 = vsyncpa [#allocation6], 0 }
   0x2   :  { %10 = vsyncpa [#allocation4], 0  ;;  %s1780_s12 = smov [#allocation2]   ;;  %s1781_s14 = smov [#allocation5]  }
   0x3   :  { %s17_s13 = sshll.u32 %s1780_s12, 4  ;;  %s26_s15 = sshll.u32 %s1781_s14, 4  ;;  %s18_s13 = int_to_ptr.vmem [resolvable:$true] %s17_s13  ;;  %s1805_s15 = int_to_ptr.vmem [resolvable:$true] %s26_s15 }
   0x4   :  { %s1708_s18 = scalar_lea.hbm %s1871_s0, 768 }
   0x5   :  { %p1709_p0 = scmp.ne.s32.totalorder %s1871_s0, %s1708_s18  ;;  %p1712_p1 = scmp.lt.u32.totalorder %s1708_s18, %s1871_s0 }
   0x7   :  { %p1714_p2 = pnand %p1712_p1, %p1709_p0 }
   0x9   :  { %1717 = shalt.err (!%p1714_p2)
}
   0xa   :  { %s1718_s23 = scalar_lea.vmem %s18_s13, 768  ;;  %p1723_p4 = scmp.lt.s32.totalorder %s18_s13, %s18_s13 }
   0xb   :  { %p1719_p3 = scmp.ne.s32.totalorder %s18_s13, %s1718_s23  ;;  %p1724_p5 = scmp.lt.s32.totalorder %s1718_s23, %s1718_s23 }
   0xd   :  { %p1725_p6 = por %p1724_p5, %p1723_p4 }
   0xf   :  { %p1726_p7 = pnand %p1725_p6, %p1719_p3 }
  0x11   :  { %1729 = shalt.err (!%p1726_p7)
}
  0x12   :  { %20 = dma.hbm_to_vmem [thread:$0]  %s1871_s0, 768, %s18_s13, [#allocation3]  }
  0x13   :  { %s1730_s28 = scalar_lea.hbm %s1872_s1, 18432 }
  0x14   :  { %p1731_p8 = scmp.ne.s32.totalorder %s1872_s1, %s1730_s28  ;;  %p1734_p9 = scmp.lt.u32.totalorder %s1730_s28, %s1872_s1 }
  0x16   :  { %p1736_p10 = pnand %p1734_p9, %p1731_p8 }
  0x18   :  { %1739 = shalt.err (!%p1736_p10)
}
  0x19   :  { %s1740_s6 = scalar_lea.vmem %s1805_s15, 18432  ;;  %p1745_p12 = scmp.lt.s32.totalorder %s1805_s15, %s1805_s15 }
  0x1a   :  { %p1741_p11 = scmp.ne.s32.totalorder %s1805_s15, %s1740_s6  ;;  %p1746_p13 = scmp.lt.s32.totalorder %s1740_s6, %s1740_s6 }
  0x1c   :  { %p1747_p0 = por %p1746_p13, %p1745_p12 }
  0x1e   :  { %p1748_p1 = pnand %p1747_p0, %p1741_p11 }
  0x20   :  { %1751 = shalt.err (!%p1748_p1)
}
  0x21   :  { %s1782_s0 = smov 192   ;;  %s1783_s7 = smov 12  }
  0x22   :  { %32 = dma.hbm_to_vmem [thread:$0]  %s1872_s1, 18432, %s1805_s15, [#allocation6], %s1782_s0, %s1782_s0, %s1783_s7  }
  0x23   :  { %1774 = dma.done.wait [#allocation3], 768  }
  0x24   :  { %1775 = vsyncadd [#allocation3], 4294966528 }
  0x25   :  { %1776 = dma.done.wait [#allocation6], 18432  }
  0x26   :  { %1777 = vsyncadd [#allocation6], 4294948864  ;;  %v1516_v0 = vld [vmem:[#allocation5 + $0x4] ss:$12 sps:$4 sm:$0xff]   ;;  %v1520_v2 = vld [vmem:[#allocation5] ss:$12 sps:$4 sm:$0xff]  }
  0x27   :  { %v1518_v1 = vld [vmem:[#allocation5 + $0x184] ss:$12 sps:$4 sm:$0xff]   ;;  %1031 = vmatprep.subr.bf16.mxu1 %v1516_v0  ;;  %v1521_v3 = vld [vmem:[#allocation5 + $0x180] ss:$12 sps:$4 sm:$0xff]   ;;  %v1522_v4 = vld [vmem:[#allocation5 + $0x1c] ss:$12 sps:$4 sm:$0xff]  }
  0x28   :  { %1072 = vmatprep.subr.bf16.mxu0 %v1518_v1  ;;  %1032 = vmatpush1.bf16.msra.mxu1 %v1520_v2  ;;  %v1524_v5 = vld [vmem:[#allocation5 + $0x19c] ss:$12 sps:$4 sm:$0xff]   ;;  %v1526_v6 = vld [vmem:[#allocation5 + $0x18] ss:$12 sps:$4 sm:$0xff]   ;;  %v1528_v8 = vld [vmem:[#allocation5 + $0x34] ss:$12 sps:$4 sm:$0xff]  }
  0x29   :  { %1073 = vmatpush1.bf16.msra.mxu0 %v1521_v3  ;;  %1033 = vmatprep.subr.bf16.mxu1 %v1522_v4  ;;  %v1527_v7 = vld [vmem:[#allocation5 + $0x198] ss:$12 sps:$4 sm:$0xff]   ;;  %v1530_v9 = vld [vmem:[#allocation5 + $0x1b4] ss:$12 sps:$4 sm:$0xff]   ;;  %v1532_v10 = vld [vmem:[#allocation5 + $0x30] ss:$12 sps:$4 sm:$0xff]  }
  0x2a   :  { %1074 = vmatprep.subr.bf16.mxu0 %v1524_v5  ;;  %v1533_v11 = vld [vmem:[#allocation5 + $0x1b0] ss:$12 sps:$4 sm:$0xff]   ;;  %v1534_v12 = vld [vmem:[#allocation5 + $0x4c] ss:$12 sps:$4 sm:$0xff]   ;;  %v1538_v14 = vld [vmem:[#allocation5 + $0x48] ss:$12 sps:$4 sm:$0xff]  }
  0x2b   :  { %v1536_v13 = vld [vmem:[#allocation5 + $0x1cc] ss:$12 sps:$4 sm:$0xff]   ;;  %v1539_v15 = vld [vmem:[#allocation5 + $0x1c8] ss:$12 sps:$4 sm:$0xff]   ;;  %v1540_v16 = vld [vmem:[#allocation5 + $0x64] ss:$12 sps:$4 sm:$0xff]  }
  0x2c   :  { %1034 = vmatpush1.bf16.msra.mxu1 %v1526_v6  ;;  %v1542_v17 = vld [vmem:[#allocation5 + $0x1e4] ss:$12 sps:$4 sm:$0xff]   ;;  %v1544_v18 = vld [vmem:[#allocation5 + $0x60] ss:$12 sps:$4 sm:$0xff]   ;;  %v1546_v20 = vld [vmem:[#allocation5 + $0x7c] ss:$12 sps:$4 sm:$0xff]  }
  0x2d   :  { %1075 = vmatpush1.bf16.msra.mxu0 %v1527_v7  ;;  %1035 = vmatprep.subr.bf16.mxu1 %v1528_v8  ;;  %v1545_v19 = vld [vmem:[#allocation5 + $0x1e0] ss:$12 sps:$4 sm:$0xff]   ;;  %v1548_v21 = vld [vmem:[#allocation5 + $0x1fc] ss:$12 sps:$4 sm:$0xff]   ;;  %v1550_v22 = vld [vmem:[#allocation5 + $0x78] ss:$12 sps:$4 sm:$0xff]  }
  0x2e   :  { %1076 = vmatprep.subr.bf16.mxu0 %v1530_v9  ;;  %v1551_v23 = vld [vmem:[#allocation5 + $0x1f8] ss:$12 sps:$4 sm:$0xff]   ;;  %v1552_v24 = vld [vmem:[#allocation5 + $0x94] ss:$12 sps:$4 sm:$0xff]   ;;  %v1556_v26 = vld [vmem:[#allocation5 + $0x90] ss:$12 sps:$4 sm:$0xff]  }
  0x2f   :  { %v1554_v25 = vld [vmem:[#allocation5 + $0x214] ss:$12 sps:$4 sm:$0xff]   ;;  %v1557_v27 = vld [vmem:[#allocation5 + $0x210] ss:$12 sps:$4 sm:$0xff]   ;;  %v1558_v28 = vld [vmem:[#allocation5 + $0xac] ss:$12 sps:$4 sm:$0xff]  }
  0x30   :  { %1036 = vmatpush1.bf16.msra.mxu1 %v1532_v10  ;;  %v1560_v29 = vld [vmem:[#allocation5 + $0x22c] ss:$12 sps:$4 sm:$0xff]   ;;  %v1562_v30 = vld [vmem:[#allocation5 + $0xa8] ss:$12 sps:$4 sm:$0xff]   ;;  %v1564_v32 = vld [vmem:[#allocation5 + $0xc4] ss:$12 sps:$4 sm:$0xff]  }
  0x31   :  { %1077 = vmatpush1.bf16.msra.mxu0 %v1533_v11  ;;  %1037 = vmatprep.subr.bf16.mxu1 %v1534_v12  ;;  %v1563_v31 = vld [vmem:[#allocation5 + $0x228] ss:$12 sps:$4 sm:$0xff]   ;;  %v1566_v33 = vld [vmem:[#allocation5 + $0x244] ss:$12 sps:$4 sm:$0xff]   ;;  %v1568_v34 = vld [vmem:[#allocation5 + $0xc0] ss:$12 sps:$4 sm:$0xff]  }
  0x32   :  { %1078 = vmatprep.subr.bf16.mxu0 %v1536_v13  ;;  %v1569_v35 = vld [vmem:[#allocation5 + $0x240] ss:$12 sps:$4 sm:$0xff]   ;;  %v1570_v36 = vld [vmem:[#allocation5 + $0xdc] ss:$12 sps:$4 sm:$0xff]   ;;  %v1574_v38 = vld [vmem:[#allocation5 + $0xd8] ss:$12 sps:$4 sm:$0xff]  }
  0x33   :  { %v1572_v37 = vld [vmem:[#allocation5 + $0x25c] ss:$12 sps:$4 sm:$0xff]   ;;  %v1575_v39 = vld [vmem:[#allocation5 + $0x258] ss:$12 sps:$4 sm:$0xff]   ;;  %v1576_v40 = vld [vmem:[#allocation5 + $0xf4] ss:$12 sps:$4 sm:$0xff]  }
  0x34   :  { %1038 = vmatpush1.bf16.msra.mxu1 %v1538_v14  ;;  %v1578_v41 = vld [vmem:[#allocation5 + $0x274] ss:$12 sps:$4 sm:$0xff]   ;;  %v1580_v42 = vld [vmem:[#allocation5 + $0xf0] ss:$12 sps:$4 sm:$0xff]   ;;  %v1582_v44 = vld [vmem:[#allocation5 + $0x10c] ss:$12 sps:$4 sm:$0xff]  }
  0x35   :  { %1079 = vmatpush1.bf16.msra.mxu0 %v1539_v15  ;;  %1039 = vmatprep.subr.bf16.mxu1 %v1540_v16  ;;  %v1581_v43 = vld [vmem:[#allocation5 + $0x270] ss:$12 sps:$4 sm:$0xff]   ;;  %v1584_v45 = vld [vmem:[#allocation5 + $0x28c] ss:$12 sps:$4 sm:$0xff]   ;;  %v1586_v47 = vld [vmem:[#allocation5 + $0x108] ss:$12 sps:$4 sm:$0xff]  }
  0x36   :  { %1080 = vmatprep.subr.bf16.mxu0 %v1542_v17  ;;  %v43_v46 = vld [vmem:[#allocation2 + $0x8] sm:$0xff]  ;;  %v45_v49 = vld [vmem:[#allocation2 + $0x18] sm:$0xff]  ;;  %v1588_v51 = vld [vmem:[#allocation5 + $0x124] ss:$12 sps:$4 sm:$0xff]  }
  0x37   :  { %v1836_v48 = vpack.c.bf16 %v43_v46, %v43_v46  ;;  %v1587_v50 = vld [vmem:[#allocation5 + $0x288] ss:$12 sps:$4 sm:$0xff]   ;;  %v1838_v52 = vpack.c.bf16 %v45_v49, %v45_v49  ;;  %v1590_v53 = vld [vmem:[#allocation5 + $0x2a4] ss:$12 sps:$4 sm:$0xff]   ;;  %v1592_v54 = vld [vmem:[#allocation5 + $0x120] ss:$12 sps:$4 sm:$0xff]  }
  0x38   :  { %1040 = vmatpush1.bf16.msra.mxu1 %v1544_v18  ;;  %v1593_v55 = vld [vmem:[#allocation5 + $0x2a0] ss:$12 sps:$4 sm:$0xff]   ;;  %v1594_v56 = vld [vmem:[#allocation5 + $0x13c] ss:$12 sps:$4 sm:$0xff]   ;;  %v1598_v58 = vld [vmem:[#allocation5 + $0x138] ss:$12 sps:$4 sm:$0xff]  }
  0x39   :  { %1081 = vmatpush1.bf16.msra.mxu0 %v1545_v19  ;;  %1041 = vmatprep.subr.bf16.mxu1 %v1546_v20  ;;  %v1596_v57 = vld [vmem:[#allocation5 + $0x2bc] ss:$12 sps:$4 sm:$0xff]   ;;  %v1599_v59 = vld [vmem:[#allocation5 + $0x2b8] ss:$12 sps:$4 sm:$0xff]   ;;  %v1600_v60 = vld [vmem:[#allocation5 + $0x154] ss:$12 sps:$4 sm:$0xff]  }
  0x3a   :  { %1082 = vmatprep.subr.bf16.mxu0 %v1548_v21  ;;  %1063 = vmatprep.mubr.bf16.mxu1 %v1836_v48  ;;  %v1602_v61 = vld [vmem:[#allocation5 + $0x2d4] ss:$12 sps:$4 sm:$0xff]   ;;  %v1604_v62 = vld [vmem:[#allocation5 + $0x150] ss:$12 sps:$4 sm:$0xff]   ;;  %v1606_v0 = vld [vmem:[#allocation5 + $0x16c] ss:$12 sps:$4 sm:$0xff]  }
  0x3b   :  { %1104 = vmatprep.mubr.bf16.mxu0 %v1838_v52  ;;  %v1605_v63 = vld [vmem:[#allocation5 + $0x2d0] ss:$12 sps:$4 sm:$0xff]   ;;  %v1608_v1 = vld [vmem:[#allocation5 + $0x2ec] ss:$12 sps:$4 sm:$0xff]   ;;  %v1610_v2 = vld [vmem:[#allocation5 + $0x168] ss:$12 sps:$4 sm:$0xff]  }
  0x3c   :  { %1042 = vmatpush1.bf16.msra.mxu1 %v1550_v22  ;;  %v1611_v3 = vld [vmem:[#allocation5 + $0x2e8] ss:$12 sps:$4 sm:$0xff]   ;;  %v44_v5 = vld [vmem:[#allocation2 + $0x10] sm:$0xff]  ;;  %v1622_v18 = vld [vmem:[#allocation5 + $0x330] ss:$12 sps:$4 sm:$0xff]  }
  0x3d   :  { %1083 = vmatpush1.bf16.msra.mxu0 %v1551_v23  ;;  %1043 = vmatprep.subr.bf16.mxu1 %v1552_v24  ;;  %v42_v4 = vld [vmem:[#allocation2] sm:$0xff]  ;;  %v1612_v8 = vld [vmem:[#allocation5 + $0x300] ss:$12 sps:$4 sm:$0xff]   ;;  %v1844_v10 = vpack.c.bf16 %v44_v5, %v44_v5  ;;  %v1619_v12 = vld [vmem:[#allocation5 + $0x31c] ss:$12 sps:$4 sm:$0xff]  }
  0x3e   :  { %1084 = vmatprep.subr.bf16.mxu0 %v1554_v25  ;;  %v1614_v6 = vld [vmem:[#allocation5 + $0x304] ss:$12 sps:$4 sm:$0xff]   ;;  %v1615_v7 = vld [vmem:[#allocation5 + $0xc8] ss:$12 sps:$4 sm:$0xff]   ;;  %v1842_v9 = vpack.c.bf16 %v42_v4, %v42_v4  ;;  %v1620_v13 = vld [vmem:[#allocation5 + $0xe0] ss:$12 sps:$4 sm:$0xff]  }
  0x3f   :  { %v1616_v11 = vld [vmem:[#allocation5 + $0x8] ss:$12 sps:$4 sm:$0xff]   ;;  %v1617_v14 = vld [vmem:[#allocation5 + $0x318] ss:$12 sps:$4 sm:$0xff]   ;;  %v1621_v15 = vld [vmem:[#allocation5 + $0x20] ss:$12 sps:$4 sm:$0xff]  }
  0x40   :  { %1044 = vmatpush1.bf16.msra.mxu1 %v1556_v26  ;;  %v1624_v16 = vld [vmem:[#allocation5 + $0x334] ss:$12 sps:$4 sm:$0xff]   ;;  %v1625_v17 = vld [vmem:[#allocation5 + $0xf8] ss:$12 sps:$4 sm:$0xff]   ;;  %v1630_v21 = vld [vmem:[#allocation5 + $0x110] ss:$12 sps:$4 sm:$0xff]  }
  0x41   :  { %1085 = vmatpush1.bf16.msra.mxu0 %v1557_v27  ;;  %1045 = vmatprep.subr.bf16.mxu1 %v1558_v28  ;;  %v1626_v19 = vld [vmem:[#allocation5 + $0x38] ss:$12 sps:$4 sm:$0xff]   ;;  %v1627_v22 = vld [vmem:[#allocation5 + $0x348] ss:$12 sps:$4 sm:$0xff]   ;;  %v1631_v23 = vld [vmem:[#allocation5 + $0x50] ss:$12 sps:$4 sm:$0xff]  }
  0x42   :  { %1086 = vmatprep.subr.bf16.mxu0 %v1560_v29  ;;  %v1629_v20 = vld [vmem:[#allocation5 + $0x34c] ss:$12 sps:$4 sm:$0xff]   ;;  %v1634_v24 = vld [vmem:[#allocation5 + $0x364] ss:$12 sps:$4 sm:$0xff]   ;;  %v1635_v25 = vld [vmem:[#allocation5 + $0x128] ss:$12 sps:$4 sm:$0xff]  }
  0x43   :  { %v1632_v26 = vld [vmem:[#allocation5 + $0x360] ss:$12 sps:$4 sm:$0xff]   ;;  %v1636_v27 = vld [vmem:[#allocation5 + $0x68] ss:$12 sps:$4 sm:$0xff]   ;;  %v47_v46 = vld [vmem:[#allocation2 + $0x28] sm:$0xff] }
  0x44   :  { %1046 = vmatpush1.bf16.msra.mxu1 %v1562_v30  ;;  %v1639_v28 = vld [vmem:[#allocation5 + $0x37c] ss:$12 sps:$4 sm:$0xff]   ;;  %v1640_v29 = vld [vmem:[#allocation5 + $0x140] ss:$12 sps:$4 sm:$0xff]   ;;  %v1637_v30 = vld [vmem:[#allocation5 + $0x378] ss:$12 sps:$4 sm:$0xff]  }
  0x45   :  { %1087 = vmatpush1.bf16.msra.mxu0 %v1563_v31  ;;  %1047 = vmatprep.subr.bf16.mxu1 %v1564_v32  ;;  %v1641_v31 = vld [vmem:[#allocation5 + $0x80] ss:$12 sps:$4 sm:$0xff]   ;;  %v1682_v4 = vld [vmem:[#allocation5 + $0x450] ss:$12 sps:$4 sm:$0xff]   ;;  %v1686_v5 = vld [vmem:[#allocation5 + $0x218] ss:$12 sps:$4 sm:$0xff]  }
  0x46   :  { %1088 = vmatprep.subr.bf16.mxu0 %v1566_v33  ;;  %v1644_v32 = vld [vmem:[#allocation5 + $0x394] ss:$12 sps:$4 sm:$0xff]   ;;  %v1645_v33 = vld [vmem:[#allocation5 + $0x158] ss:$12 sps:$4 sm:$0xff]  }
  0x47   :  { %v1661_v49 = vld [vmem:[#allocation5 + $0x1a0] ss:$12 sps:$4 sm:$0xff]  }
  0x48   :  { %1048 = vmatpush1.bf16.msra.mxu1 %v1568_v34  ;;  %v1642_v34 = vld [vmem:[#allocation5 + $0x390] ss:$12 sps:$4 sm:$0xff]  }
  0x49   :  { %1089 = vmatpush1.bf16.msra.mxu0 %v1569_v35  ;;  %1049 = vmatprep.subr.bf16.mxu1 %v1570_v36  ;;  %v1646_v35 = vld [vmem:[#allocation5 + $0x98] ss:$12 sps:$4 sm:$0xff]  }
  0x4a   :  { %1090 = vmatprep.subr.bf16.mxu0 %v1572_v37  ;;  %v1649_v36 = vld [vmem:[#allocation5 + $0x3ac] ss:$12 sps:$4 sm:$0xff]   ;;  %v1650_v37 = vld [vmem:[#allocation5 + $0x170] ss:$12 sps:$4 sm:$0xff]  }
  0x4c   :  { %1050 = vmatpush1.bf16.msra.mxu1 %v1574_v38  ;;  %v1647_v38 = vld [vmem:[#allocation5 + $0x3a8] ss:$12 sps:$4 sm:$0xff]  }
  0x4d   :  { %1091 = vmatpush1.bf16.msra.mxu0 %v1575_v39  ;;  %1051 = vmatprep.subr.bf16.mxu1 %v1576_v40  ;;  %v1651_v39 = vld [vmem:[#allocation5 + $0xb0] ss:$12 sps:$4 sm:$0xff]  }
  0x4e   :  { %1092 = vmatprep.subr.bf16.mxu0 %v1578_v41  ;;  %v1654_v40 = vld [vmem:[#allocation5 + $0x3c4] ss:$12 sps:$4 sm:$0xff]   ;;  %v1655_v41 = vld [vmem:[#allocation5 + $0x248] ss:$12 sps:$4 sm:$0xff]  }
  0x50   :  { %1052 = vmatpush1.bf16.msra.mxu1 %v1580_v42  ;;  %v1652_v42 = vld [vmem:[#allocation5 + $0x3c0] ss:$12 sps:$4 sm:$0xff]  }
  0x51   :  { %1093 = vmatpush1.bf16.msra.mxu0 %v1581_v43  ;;  %1053 = vmatprep.subr.bf16.mxu1 %v1582_v44  ;;  %v1656_v43 = vld [vmem:[#allocation5 + $0x188] ss:$12 sps:$4 sm:$0xff]  }
  0x52   :  { %1094 = vmatprep.subr.bf16.mxu0 %v1584_v45  ;;  %v1659_v44 = vld [vmem:[#allocation5 + $0x3dc] ss:$12 sps:$4 sm:$0xff]   ;;  %v1660_v45 = vld [vmem:[#allocation5 + $0x260] ss:$12 sps:$4 sm:$0xff]  }
  0x54   :  { %1054 = vmatpush1.bf16.msra.mxu1 %v1586_v47  ;;  %v1657_v47 = vld [vmem:[#allocation5 + $0x3d8] ss:$12 sps:$4 sm:$0xff]  }
  0x55   :  { %1095 = vmatpush1.bf16.msra.mxu0 %v1587_v50  ;;  %1055 = vmatprep.subr.bf16.mxu1 %v1588_v51  ;;  %v1664_v50 = vld [vmem:[#allocation5 + $0x3f4] ss:$12 sps:$4 sm:$0xff]   ;;  %v1665_v51 = vld [vmem:[#allocation5 + $0x278] ss:$12 sps:$4 sm:$0xff]  }
  0x56   :  { %1096 = vmatprep.subr.bf16.mxu0 %v1590_v53  ;;  %v1662_v53 = vld [vmem:[#allocation5 + $0x3f0] ss:$12 sps:$4 sm:$0xff]  }
  0x58   :  { %1056 = vmatpush1.bf16.msra.mxu1 %v1592_v54  ;;  %v1666_v54 = vld [vmem:[#allocation5 + $0x1b8] ss:$12 sps:$4 sm:$0xff]  }
  0x59   :  { %1097 = vmatpush1.bf16.msra.mxu0 %v1593_v55  ;;  %1057 = vmatprep.subr.bf16.mxu1 %v1594_v56  ;;  %v1669_v55 = vld [vmem:[#allocation5 + $0x40c] ss:$12 sps:$4 sm:$0xff]   ;;  %v1670_v56 = vld [vmem:[#allocation5 + $0x290] ss:$12 sps:$4 sm:$0xff]  }
  0x5a   :  { %1098 = vmatprep.subr.bf16.mxu0 %v1596_v57  ;;  %v1667_v57 = vld [vmem:[#allocation5 + $0x408] ss:$12 sps:$4 sm:$0xff]  }
  0x5c   :  { %1058 = vmatpush1.bf16.msra.mxu1 %v1598_v58  ;;  %v1671_v58 = vld [vmem:[#allocation5 + $0x1d0] ss:$12 sps:$4 sm:$0xff]  }
  0x5d   :  { %1099 = vmatpush1.bf16.msra.mxu0 %v1599_v59  ;;  %1059 = vmatprep.subr.bf16.mxu1 %v1600_v60  ;;  %v1674_v59 = vld [vmem:[#allocation5 + $0x424] ss:$12 sps:$4 sm:$0xff]   ;;  %v1675_v60 = vld [vmem:[#allocation5 + $0x2a8] ss:$12 sps:$4 sm:$0xff]  }
  0x5e   :  { %1100 = vmatprep.subr.bf16.mxu0 %v1602_v61  ;;  %v1672_v61 = vld [vmem:[#allocation5 + $0x420] ss:$12 sps:$4 sm:$0xff]  }
  0x60   :  { %1060 = vmatpush1.bf16.msra.mxu1 %v1604_v62  ;;  %v1676_v62 = vld [vmem:[#allocation5 + $0x1e8] ss:$12 sps:$4 sm:$0xff]  }
  0x61   :  { %1101 = vmatpush1.bf16.msra.mxu0 %v1605_v63  ;;  %1061 = vmatprep.subr.bf16.mxu1 %v1606_v0  ;;  %v1680_v63 = vld [vmem:[#allocation5 + $0x2c0] ss:$12 sps:$4 sm:$0xff]   ;;  %v1677_v0 = vld [vmem:[#allocation5 + $0x438] ss:$12 sps:$4 sm:$0xff]  }
  0x62   :  { %1102 = vmatprep.subr.bf16.mxu0 %v1608_v1  ;;  %v1681_v1 = vld [vmem:[#allocation5 + $0x200] ss:$12 sps:$4 sm:$0xff]  }
  0x64   :  { %1062 = vmatpush1.bf16.msra.mxu1 %v1610_v2  ;;  %v1684_v2 = vld [vmem:[#allocation5 + $0x454] ss:$12 sps:$4 sm:$0xff]  }
  0x65   :  { %1103 = vmatpush1.bf16.msra.mxu0 %v1611_v3  ;;  %1437 = vmatprep.subr.bf16.mxu1 %v1615_v7  ;;  %v1685_v3 = vld [vmem:[#allocation5 + $0x2d8] ss:$12 sps:$4 sm:$0xff]   ;;  %v1690_v7 = vld [vmem:[#allocation5 + $0x2f0] ss:$12 sps:$4 sm:$0xff]  }
  0x66   :  { %1113 = vmatprep.subr.bf16.mxu0 %v1614_v6  ;;  %v1689_v6 = vld [vmem:[#allocation5 + $0x46c] ss:$12 sps:$4 sm:$0xff]  }
  0x67   :  { %1064 = vmatmul.mubr.bf16.vlgmr.msra.gmra.mrb[0].mxu1 %v1842_v9 }
  0x68   :  { %1105 = vmatmul.mubr.bf16.vlgmr.msra.gmra.mrb[0].mxu0 %v1844_v10  ;;  %1438 = vmatpush3.bf16.msra.mxu1 %v1616_v11  ;;  %v46_v11 = vld [vmem:[#allocation2 + $0x20] sm:$0xff] }
  0x69   :  { %1114 = vmatpush1.bf16.msra.mxu0 %v1612_v8  ;;  %1439 = vmatprep.subr.bf16.mxu1 %v1620_v13  ;;  %v1687_v8 = vld [vmem:[#allocation5 + $0x468] ss:$12 sps:$4 sm:$0xff]   ;;  %v52_v13 = vpack.c.bf16 %v46_v11, %v46_v11 }
  0x6a   :  { %1115 = vmatprep.subr.bf16.mxu0 %v1619_v12  ;;  %1186 = vmatprep.mubr.bf16.mxu1 %v1836_v48  ;;  %v1849_v48 = vpack.c.bf16 %v47_v46, %v47_v46  ;;  %v1692_v12 = vld [vmem:[#allocation5 + $0x3c8] ss:$12 sps:$4 sm:$0xff]  }
  0x6c   :  { %1440 = vmatpush3.bf16.msra.mxu1 %v1621_v15  ;;  %1145 = vmatprep.mubr.bf16.mxu0 %v1849_v48  ;;  %v1694_v15 = vld [vmem:[#allocation5 + $0x3e0] ss:$12 sps:$4 sm:$0xff]  }
  0x6d   :  { %1116 = vmatpush1.bf16.msra.mxu0 %v1617_v14  ;;  %1441 = vmatprep.subr.bf16.mxu1 %v1625_v17  ;;  %v1693_v14 = vld [vmem:[#allocation5 + $0x308] ss:$12 sps:$4 sm:$0xff]   ;;  %v1696_v17 = vld [vmem:[#allocation5 + $0x3f8] ss:$12 sps:$4 sm:$0xff]  }
  0x6e   :  { %1117 = vmatprep.subr.bf16.mxu0 %v1624_v16  ;;  %v1695_v16 = vld [vmem:[#allocation5 + $0x320] ss:$12 sps:$4 sm:$0xff]  }
  0x70   :  { %1442 = vmatpush3.bf16.msra.mxu1 %v1626_v19  ;;  %v1698_v19 = vld [vmem:[#allocation5 + $0x410] ss:$12 sps:$4 sm:$0xff]  }
  0x71   :  { %1118 = vmatpush1.bf16.msra.mxu0 %v1622_v18  ;;  %1443 = vmatprep.subr.bf16.mxu1 %v1630_v21  ;;  %v1697_v18 = vld [vmem:[#allocation5 + $0x338] ss:$12 sps:$4 sm:$0xff]   ;;  %v1700_v21 = vld [vmem:[#allocation5 + $0x428] ss:$12 sps:$4 sm:$0xff]  }
  0x72   :  { %1119 = vmatprep.subr.bf16.mxu0 %v1629_v20  ;;  %v1699_v20 = vld [vmem:[#allocation5 + $0x350] ss:$12 sps:$4 sm:$0xff]  }
  0x74   :  { %1444 = vmatpush3.bf16.msra.mxu1 %v1631_v23  ;;  %v1702_v23 = vld [vmem:[#allocation5 + $0x440] ss:$12 sps:$4 sm:$0xff]  }
  0x75   :  { %1120 = vmatpush1.bf16.msra.mxu0 %v1627_v22  ;;  %1445 = vmatprep.subr.bf16.mxu1 %v1635_v25  ;;  %v1701_v22 = vld [vmem:[#allocation5 + $0x368] ss:$12 sps:$4 sm:$0xff]   ;;  %v1705_v25 = vld [vmem:[#allocation5 + $0x398] ss:$12 sps:$4 sm:$0xff]  }
  0x76   :  { %1121 = vmatprep.subr.bf16.mxu0 %v1634_v24  ;;  %v1704_v24 = vld [vmem:[#allocation5 + $0x458] ss:$12 sps:$4 sm:$0xff]  }
  0x78   :  { %1446 = vmatpush3.bf16.msra.mxu1 %v1636_v27  ;;  %v1707_v27 = vld [vmem:[#allocation5 + $0x3b0] ss:$12 sps:$4 sm:$0xff]  }
  0x79   :  { %1122 = vmatpush1.bf16.msra.mxu0 %v1632_v26  ;;  %1447 = vmatprep.subr.bf16.mxu1 %v1640_v29  ;;  %v1706_v26 = vld [vmem:[#allocation5 + $0x470] ss:$12 sps:$4 sm:$0xff]  }
  0x7a   :  { %1123 = vmatprep.subr.bf16.mxu0 %v1639_v28 }
  0x7c   :  { %1448 = vmatpush3.bf16.msra.mxu1 %v1641_v31 }
  0x7d   :  { %1124 = vmatpush1.bf16.msra.mxu0 %v1637_v30  ;;  %1449 = vmatprep.subr.bf16.mxu1 %v1645_v33 }
  0x7e   :  { %1125 = vmatprep.subr.bf16.mxu0 %v1644_v32 }
  0x80   :  { %1450 = vmatpush3.bf16.msra.mxu1 %v1646_v35 }
  0x81   :  { %1126 = vmatpush1.bf16.msra.mxu0 %v1642_v34  ;;  %1451 = vmatprep.subr.bf16.mxu1 %v1650_v37  ;;  %v248_v37 = vlaneseq }
  0x82   :  { %1127 = vmatprep.subr.bf16.mxu0 %v1649_v36 }
  0x84   :  { %1452 = vmatpush3.bf16.msra.mxu1 %v1651_v39 }
  0x85   :  { %1128 = vmatpush1.bf16.msra.mxu0 %v1647_v38  ;;  %1459 = vmatprep.subr.bf16.mxu1 %v1655_v41  ;;  %v249_v38 = vshrl.u32 %v248_v37, 7 }
  0x86   :  { %1129 = vmatprep.subr.bf16.mxu0 %v1654_v40  ;;  %v246_v40 = vld [vmem:[%s1873_s2] sm:$0x7]  ;;  %s1784_s2 = smov [#allocation7]  }
  0x87   :  { %1187 = vmatmul.mubr.bf16.vlgmr.msra.gmra.mrb[4].mxu1 %v1842_v9  ;;  %v1691_v9 = vld [vmem:[#allocation5 + $0x230] ss:$12 sps:$4 sm:$0xff]   ;;  %v250_v39 = vsub.s32 0, %v249_v38  ;;  %v254_v41 = vsub.s32 1, %v249_v38  ;;  %s1283_s11 = sshll.u32 %s1784_s2, 4  ;;  %s1284_s11 = int_to_ptr.vmem [resolvable:$true] %s1283_s11 }
  0x88   :  { %1460 = vmatpush3.bf16.msra.mxu1 %v1656_v43  ;;  %1226 = vmatprep.mubr.bf16.mxu1 %v1838_v52  ;;  %v1679_v52 = vld [vmem:[#allocation5 + $0x43c] ss:$12 sps:$4 sm:$0xff]   ;;  %s1752_s12 = scalar_lea.vmem %s1284_s11, 384  ;;  %p1757_p3 = scmp.lt.s32.totalorder %s1284_s11, %s1284_s11 }
  0x89   :  { %1130 = vmatpush1.bf16.msra.mxu0 %v1652_v42  ;;  %1461 = vmatprep.subr.bf16.mxu1 %v1660_v45  ;;  %v258_v42 = vsub.s32 2, %v249_v38  ;;  %v251_v43 = vrot.slane %v246_v40, %v250_v39  ;;  %p1753_p2 = scmp.ne.s32.totalorder %s1284_s11, %s1752_s12  ;;  %p1758_p4 = scmp.lt.s32.totalorder %s1752_s12, %s1752_s12 }
  0x8a   :  { %1131 = vmatprep.subr.bf16.mxu0 %v1659_v44  ;;  %v255_v44 = vrot.slane %v246_v40, %v254_v41 }
  0x8b   :  { %v259_v45 = vrot.slane %v246_v40, %v258_v42  ;;  %p1759_p5 = por %p1758_p4, %p1757_p3 }
  0x8c   :  { %1462 = vmatpush3.bf16.msra.mxu1 %v1661_v49 }
  0x8d   :  { %1132 = vmatpush1.bf16.msra.mxu0 %v1657_v47  ;;  %1463 = vmatprep.subr.bf16.mxu1 %v1665_v51  ;;  %p1760_p6 = pnand %p1759_p5, %p1753_p2 }
  0x8e   :  { %1133 = vmatprep.subr.bf16.mxu0 %v1664_v50 }
  0x90   :  { %1464 = vmatpush3.bf16.msra.mxu1 %v1666_v54 }
  0x91   :  { %1134 = vmatpush1.bf16.msra.mxu0 %v1662_v53  ;;  %1465 = vmatprep.subr.bf16.mxu1 %v1670_v56 }
  0x92   :  { %1135 = vmatprep.subr.bf16.mxu0 %v1669_v55 }
  0x94   :  { %1466 = vmatpush3.bf16.msra.mxu1 %v1671_v58 }
  0x95   :  { %1136 = vmatpush1.bf16.msra.mxu0 %v1667_v57  ;;  %1467 = vmatprep.subr.bf16.mxu1 %v1675_v60 }
  0x96   :  { %1137 = vmatprep.subr.bf16.mxu0 %v1674_v59 }
  0x98   :  { %1468 = vmatpush3.bf16.msra.mxu1 %v1676_v62 }
  0x99   :  { %1138 = vmatpush1.bf16.msra.mxu0 %v1672_v61  ;;  %1469 = vmatprep.subr.bf16.mxu1 %v1680_v63 }
  0x9a   :  { %1139 = vmatprep.subr.bf16.mxu0 %v1679_v52 }
  0x9c   :  { %1470 = vmatpush3.bf16.msra.mxu1 %v1681_v1 }
  0x9d   :  { %1140 = vmatpush1.bf16.msra.mxu0 %v1677_v0  ;;  %1471 = vmatprep.subr.bf16.mxu1 %v1685_v3 }
  0x9e   :  { %1141 = vmatprep.subr.bf16.mxu0 %v1684_v2 }
  0xa0   :  { %1472 = vmatpush3.bf16.msra.mxu1 %v1686_v5 }
  0xa1   :  { %1142 = vmatpush1.bf16.msra.mxu0 %v1682_v4  ;;  %1473 = vmatprep.subr.bf16.mxu1 %v1690_v7 }
  0xa2   :  { %1143 = vmatprep.subr.bf16.mxu0 %v1689_v6 }
  0xa4   :  { %1474 = vmatpush3.bf16.msra.mxu1 %v1691_v9 }
  0xa5   :  { %1144 = vmatpush1.bf16.msra.mxu0 %v1687_v8  ;;  %1481 = vmatprep.subr.bf16.mxu1 %v1692_v12 }
  0xa7   :  { %1227 = vmatmul.mubr.bf16.vlgmr.msra.gmra.mrb[8].mxu1 %v1844_v10  ;;  %v1703_v10 = vld [vmem:[#allocation5 + $0x380] ss:$12 sps:$4 sm:$0xff]  }
  0xa8   :  { %1146 = vmatmul.mubr.bf16.vlgmr.msra.gmra.mrb[0].mxu0 %v52_v13  ;;  %1482 = vmatpush3.bf16.msra.mxu1 %v1693_v14 }
  0xa9   :  { %1266 = vmatprep.mubr.bf16.mxu1 %v1849_v48  ;;  %1483 = vmatprep.subr.bf16.mxu1 %v1694_v15 }
  0xac   :  { %1484 = vmatpush3.bf16.msra.mxu1 %v1695_v16 }
  0xad   :  { %1485 = vmatprep.subr.bf16.mxu1 %v1696_v17 }
  0xb0   :  { %1486 = vmatpush3.bf16.msra.mxu1 %v1697_v18 }
  0xb1   :  { %1487 = vmatprep.subr.bf16.mxu1 %v1698_v19 }
  0xb4   :  { %1488 = vmatpush3.bf16.msra.mxu1 %v1699_v20 }
  0xb5   :  { %1489 = vmatprep.subr.bf16.mxu1 %v1700_v21 }
  0xb8   :  { %1490 = vmatpush3.bf16.msra.mxu1 %v1701_v22 }
  0xb9   :  { %1491 = vmatprep.subr.bf16.mxu1 %v1702_v23 }
  0xbc   :  { %1492 = vmatpush3.bf16.msra.mxu1 %v1703_v10 }
  0xbd   :  { %1493 = vmatprep.subr.bf16.mxu1 %v1704_v24 }
  0xc0   :  { %1494 = vmatpush3.bf16.msra.mxu1 %v1705_v25 }
  0xc1   :  { %1495 = vmatprep.subr.bf16.mxu1 %v1706_v26 }
  0xc4   :  { %1496 = vmatpush3.bf16.msra.mxu1 %v1707_v27 }
  0xc7   :  { %1267 = vmatmul.mubr.bf16.vlgmr.msra.gmra.mrb[12].mxu1 %v52_v13 }
 0x13a   :  { %v1065_v28 = vpop.f32.mrb[0].mxu1 }
 0x13b   :  { %v1067_v29 = vpop.f32.mrb[1].mxu1  ;;  %v1066_v46 = vadd.f32 %v1065_v28, %v251_v43 }
 0x13c   :  { %v1069_v30 = vpop.f32.mrb[2].mxu1  ;;  %v1068_v47 = vadd.f32 %v1067_v29, %v255_v44 }
 0x13d   :  { %v1070_v31 = vpop.f32.mrb[3].mxu1 }
 0x15a   :  { %v1453_v32 = vpop.f32.mrb[4].mxu1 }
 0x15b   :  { %v1454_v33 = vpop.f32.mrb[5].mxu1 }
 0x15c   :  { %v1455_v34 = vadd.f32 %v1454_v33, %v1453_v32  ;;  %v1456_v35 = vpop.f32.mrb[6].mxu1 }
 0x15d   :  { %v1457_v36 = vpop.f32.mrb[7].mxu1 }
 0x15e   :  { %v1189_v54 = vadd.f32 %v1455_v34, %v259_v45 }
 0x17a   :  { %v1475_v49 = vpop.f32.mrb[8].mxu1 }
 0x17b   :  { %v1147_v48 = vpop.f32.mrb[0].mxu0  ;;  %v1476_v53 = vpop.f32.mrb[9].mxu1 }
 0x17c   :  { %v1504_v50 = vadd.f32 %v1147_v48, %v1066_v46  ;;  %v1149_v51 = vpop.f32.mrb[1].mxu0  ;;  %v1477_v56 = vadd.f32 %v1476_v53, %v1475_v49  ;;  %v1478_v58 = vpop.f32.mrb[10].mxu1 }
 0x17d   :  { %v1506_v55 = vadd.f32 %v1149_v51, %v1068_v47  ;;  %v1151_v57 = vpop.f32.mrb[2].mxu0  ;;  %v1479_v60 = vpop.f32.mrb[11].mxu1 }
 0x17e   :  { %1274 = vst [vmem:[#allocation7] sm:$0xff] %v1504_v50  ;;  %v1152_v59 = vpop.f32.mrb[3].mxu0  ;;  %v1229_v61 = vadd.f32 %v1477_v56, %v1189_v54 }
 0x17f   :  { %1275 = vst [vmem:[#allocation7 + $0x8] sm:$0xff] %v1506_v55 }
 0x19a   :  { %v1497_v62 = vpop.f32.mrb[12].mxu1 }
 0x19b   :  { %v1498_v52 = vpop.f32.mrb[13].mxu1 }
 0x19c   :  { %v1499_v63 = vadd.f32 %v1498_v52, %v1497_v62  ;;  %v1500_v0 = vpop.f32.mrb[14].mxu1 }
 0x19d   :  { %v1501_v1 = vpop.f32.mrb[15].mxu1 }
 0x19e   :  { %v1269_v2 = vadd.f32 %v1499_v63, %v1229_v61 }
 0x1a0   :  { %1276 = vst [vmem:[#allocation7 + $0x10] sm:$0xff] %v1269_v2 }
 0x1a1   :  { %1763 = shalt.err (!%p1760_p6)
}
 0x1a2   :  { %s1764_s15 = scalar_lea.hbm %s1874_s3, 384 }
 0x1a3   :  { %p1765_p7 = scmp.ne.s32.totalorder %s1874_s3, %s1764_s15  ;;  %p1768_p8 = scmp.lt.u32.totalorder %s1764_s15, %s1874_s3 }
 0x1a5   :  { %p1770_p9 = pnand %p1768_p8, %p1765_p7 }
 0x1a7   :  { %1773 = shalt.err (!%p1770_p9)
}
 0x1a8   :  { %1286 = dma.vmem_to_hbm [thread:$0]  %s1284_s11, 384, %s1874_s3, [#allocation4]  }
 0x1a9   :  { %1778 = dma.done.wait [#allocation4], 384  }
 0x1aa   :  { %1779 = vsyncadd [#allocation4], 4294966912 }
 0x1ab   :  { %1290 = vsyncpa [#allocation3], 1 }
 0x1ac   :  { %1291 = vsyncpa [#allocation6], 1 }
 0x1ad   :  { %1292 = vsyncpa [#allocation4], 1 }

</bundles_post_ra>
